<compile_context>
chip_gen: v6e
topology: v6e:2x2x1
jax: 0.10.0
libtpu: 0.0.40
codegen_flags: <defaults>
</compile_context>

<pallas_src>
import functools

import jax
import jax.numpy as jnp
from jax import lax
from jax.experimental import pallas as pl
from jax.experimental.pallas import tpu as pltpu


def _round_up(a, b):
    return (a + b - 1) // b * b


def _conv_kernel(p_ref, w_ref, y_ref):
    """One row tile of the im2col conv: (TM, Kp) @ (Kp, Cp) on the MXU."""
    y = jnp.dot(p_ref[...], w_ref[...], preferred_element_type=jnp.float32)
    y_ref[...] = y.astype(y_ref.dtype)


def _conv_stats_kernel(p_ref, w_ref, y_ref, sum_ref, sq_ref):
    """Conv row tile + per-row-tile per-channel BN partial sums.

    p_ref:   (TM, Kp)    im2col patch tile (mxu dtype)
    w_ref:   (Kp, Cp)    full reshaped conv weight, VMEM-resident across the grid
    y_ref:   (TM, Cp)    pre-BN conv output tile (store dtype, usually bf16)
    sum_ref: (1, 1, Cp)  per-tile per-channel sum of y   (f32, from the f32 dot)
    sq_ref:  (1, 1, Cp)  per-tile per-channel sum of y*y (f32)
    """
    y = jnp.dot(p_ref[...], w_ref[...], preferred_element_type=jnp.float32)
    y_ref[...] = y.astype(y_ref.dtype)
    sum_ref[...] = jnp.sum(y, axis=0).reshape(sum_ref.shape)
    sq_ref[...] = jnp.sum(y * y, axis=0).reshape(sq_ref.shape)


def _bn_act_kernel(y_ref, aff_ref, o_ref, *, use_act):
    """Element-wise y*scale + shift, then per-channel leaky relu (f32 math).

    y_ref:   (TM2, Cp) pre-BN conv output tile (bf16 or f32)
    aff_ref: (3, Cp)   row 0: scale, row 1: shift, row 2: negative slope (f32)
    o_ref:   (TM2, Cp) output tile, aliased onto y_ref's HBM buffer
    """
    y = y_ref[...].astype(jnp.float32) * aff_ref[0:1, :] + aff_ref[1:2, :]
    if use_act:
        y = jnp.where(y > 0, y, aff_ref[2:3, :] * y)
    o_ref[...] = y.astype(o_ref.dtype)


def conv_layer_forward(x_nchw, weight_oihw, gamma, beta, alpha, *,
                       stride=1, padding=1, use_bn=True, use_act=True,
                       eps=1e-5, mxu_dtype=jnp.bfloat16, store_dtype=None,
                       tile_m=256):
    """Forward of ConvLayer. x_nchw: (N, Cin, H, W), PyTorch layout/semantics.

    When use_bn=False the Conv2d bias must be passed in as `beta` (scale=1,
    shift=bias), matching `bias = not use_bn` in the PyTorch module.
    """
    N, Cin, H, W = x_nchw.shape
    Cout, Cin_w, KH, KW = weight_oihw.shape
    assert Cin == Cin_w
    if store_dtype is None:
        store_dtype = jnp.float32 if mxu_dtype == jnp.float32 else jnp.bfloat16

    Ho = (H + 2 * padding - KH) // stride + 1
    Wo = (W + 2 * padding - KW) // stride + 1
    M = N * Ho * Wo            # output "rows" (one per output pixel)
    K = KH * KW * Cin          # contraction size after folding the taps

    # NCHW -> NHWC only at the PyTorch boundary.  Cast to the MXU dtype BEFORE the
    # im2col so the 9x-inflated patch intermediate is written/read at half width.
    x = jnp.transpose(x_nchw, (0, 2, 3, 1)).astype(mxu_dtype)
    xp = jnp.pad(x, ((0, 0), (padding, padding), (padding, padding), (0, 0)))
    taps = []
    for kh in range(KH):
        for kw in range(KW):
            taps.append(xp[:, kh:kh + (Ho - 1) * stride + 1:stride,
                           kw:kw + (Wo - 1) * stride + 1:stride, :])
    patches = jnp.concatenate(taps, axis=-1).reshape(M, K)

    # OIHW -> (kh, kw, cin) x cout, matching the patch tap order above.
    w2 = jnp.transpose(weight_oihw, (2, 3, 1, 0)).reshape(K, Cout).astype(mxu_dtype)

    # Lane-dense padding: K / Cout up to multiples of 128, rows to a multiple of 16
    # (bf16 sublane packing).  K is NOT over-padded to a tile multiple anymore: the
    # whole padded K is one MXU contraction with the weight resident in VMEM.
    Kp = _round_up(K, 128)
    Cp = _round_up(Cout, 128)
    TM = _round_up(min(tile_m, M), 16)
    if TM >= M and M > 32:
        # Whole problem would be a single row tile: split in two so the parallel
        # grid axis has work for v7x's second TensorCore.
        TM = _round_up((M + 1) // 2, 16)
    Mp = _round_up(M, TM)
    nm = Mp // TM

    patches_p = jnp.pad(patches, ((0, Mp - M), (0, Kp - K)))
    w_p = jnp.pad(w2, ((0, Kp - K), (0, Cp - Cout)))

    mxu_bytes = jnp.dtype(mxu_dtype).itemsize
    store_bytes = jnp.dtype(store_dtype).itemsize

    # VMEM budget from the actual tile plan, capped for v7x's 64 MiB physical VMEM.
    pass1_vmem = (2 * TM * Kp * mxu_bytes        # double-buffered patch tiles
                  + 2 * Kp * Cp * mxu_bytes      # resident weight (budget 2 bufs)
                  + 2 * TM * Cp * store_bytes    # double-buffered output tiles
                  + 4 * 2 * Cp * 4)              # stats outputs
    vmem_limit = int(min(48 * 1024 * 1024, max(32 * 1024 * 1024, 2 * pass1_vmem)))

    cost = pl.CostEstimate(
        flops=2 * Mp * Kp * Cp,
        transcendentals=0,
        bytes_accessed=int(Mp * Kp * mxu_bytes + Kp * Cp * mxu_bytes
                           + Mp * Cp * store_bytes + 2 * nm * Cp * 4))

    params1 = pltpu.CompilerParams(dimension_semantics=("parallel",),
                                   vmem_limit_bytes=vmem_limit)

    # ---- Pass 1: conv (one MXU matmul per row tile) (+ BN partial stats). ----
    if use_bn:
        y2d, psum, psq = pl.pallas_call(
            _conv_stats_kernel,
            out_shape=(jax.ShapeDtypeStruct((Mp, Cp), store_dtype),
                       jax.ShapeDtypeStruct((nm, 1, Cp), jnp.float32),
                       jax.ShapeDtypeStruct((nm, 1, Cp), jnp.float32)),
            grid_spec=pltpu.PrefetchScalarGridSpec(
                num_scalar_prefetch=0,
                grid=(nm,),
                in_specs=[pl.BlockSpec((TM, Kp), lambda i: (i, 0)),
                          pl.BlockSpec((Kp, Cp), lambda i: (0, 0))],  # resident
                out_specs=[pl.BlockSpec((TM, Cp), lambda i: (i, 0)),
                           pl.BlockSpec((1, 1, Cp), lambda i: (i, 0, 0)),
                           pl.BlockSpec((1, 1, Cp), lambda i: (i, 0, 0))]),
            compiler_params=params1,
            cost_estimate=cost,
        )(patches_p, w_p)
    else:
        y2d = pl.pallas_call(
            _conv_kernel,
            out_shape=jax.ShapeDtypeStruct((Mp, Cp), store_dtype),
            grid_spec=pltpu.PrefetchScalarGridSpec(
                num_scalar_prefetch=0,
                grid=(nm,),
                in_specs=[pl.BlockSpec((TM, Kp), lambda i: (i, 0)),
                          pl.BlockSpec((Kp, Cp), lambda i: (0, 0))],
                out_specs=pl.BlockSpec((TM, Cp), lambda i: (i, 0))),
            compiler_params=params1,
            cost_estimate=cost,
        )(patches_p, w_p)

    # ---- Tiny cross-tile reduction + fold BN into per-channel scale/shift. ----
    def _pad_vec(v, fill):
        return jnp.full((Cp,), fill, jnp.float32).at[:Cout].set(
            v.reshape(-1).astype(jnp.float32))

    gamma_p = _pad_vec(gamma, 1.0)
    beta_p = _pad_vec(beta, 0.0)
    alpha_p = _pad_vec(alpha, 1.0)

    if use_bn:
        tot_sum = jnp.sum(psum, axis=(0, 1))          # (Cp,)
        tot_sq = jnp.sum(psq, axis=(0, 1))            # (Cp,)
        cnt = jnp.float32(M)                          # true (unpadded) row count
        mean = tot_sum / cnt
        # TODO(synk): switch to a shifted / two-pass variance if E[y^2]-E[y]^2
        #             cancellation becomes an issue for large-mean conv outputs.
        var = jnp.maximum(tot_sq / cnt - mean * mean, 0.0)   # biased batch variance
        inv_std = lax.rsqrt(var + jnp.float32(eps))
        scale = gamma_p * inv_std
        shift = beta_p - mean * scale
    else:
        scale = jnp.ones((Cp,), jnp.float32)
        shift = beta_p                                # conv bias path
    affine = jnp.stack([scale, shift, alpha_p], axis=0)      # (3, Cp)

    # ---- Pass 2: element-wise normalize + LeakyReLU / PReLU (memory-bound). ----
    # Larger independent row tile, written in place over y2d's HBM buffer.
    g = 1
    for cand in range(1, nm + 1):
        if nm % cand == 0 and TM * cand <= 2048 and (nm < 2 or nm // cand >= 2):
            g = cand
    TM2 = TM * g
    nm2 = Mp // TM2

    out2d = pl.pallas_call(
        functools.partial(_bn_act_kernel, use_act=use_act),
        out_shape=jax.ShapeDtypeStruct((Mp, Cp), store_dtype),
        grid_spec=pltpu.PrefetchScalarGridSpec(
            num_scalar_prefetch=0,
            grid=(nm2,),
            in_specs=[pl.BlockSpec((TM2, Cp), lambda i: (i, 0)),
                      pl.BlockSpec((3, Cp), lambda i: (0, 0))],
            out_specs=pl.BlockSpec((TM2, Cp), lambda i: (i, 0))),
        compiler_params=pltpu.CompilerParams(
            dimension_semantics=("parallel",),
            vmem_limit_bytes=vmem_limit),
        input_output_aliases={0: 0},
    )(y2d, affine)

    # TODO(synk): when stacking ConvLayers, keep the (M, Cp) slab between layers and
    #             fuse this pass into the next layer's patch load instead.
    y = out2d[:M, :Cout].astype(jnp.float32).reshape(N, Ho, Wo, Cout)
    return jnp.transpose(y, (0, 3, 1, 2))             # back to NCHW at the boundary


def reference_forward(x_nchw, weight_oihw, gamma, beta, alpha, *,
                      stride=1, padding=1, eps=1e-5):
    """Pure-JAX reference: conv -> batchnorm (batch stats) -> leaky relu."""
    y = lax.conv_general_dilated(
        x_nchw.astype(jnp.float32), weight_oihw.astype(jnp.float32),
        window_strides=(stride, stride),
        padding=((padding, padding), (padding, padding)),
        dimension_numbers=('NCHW', 'OIHW', 'NCHW'))
    mean = jnp.mean(y, axis=(0, 2, 3), keepdims=True)
    var = jnp.mean((y - mean) ** 2, axis=(0, 2, 3), keepdims=True)
    y = (y - mean) / jnp.sqrt(var + eps)
    y = y * gamma.reshape(1, -1, 1, 1) + beta.reshape(1, -1, 1, 1)
    a = alpha.reshape(1, -1, 1, 1)
    return jnp.where(y > 0, y, a * y)


if __name__ == "__main__":
    # ConvLayer(in_channels=4, out_channels=8, discriminator=True,
    #           kernel_size=3, stride=1, padding=1) -- small demo shapes.
    N, Cin, H, W = 2, 4, 16, 16
    Cout, KH, KW = 8, 3, 3

    key = jax.random.PRNGKey(0)
    kx, kw = jax.random.split(key)
    x = jax.random.normal(kx, (N, Cin, H, W), dtype=jnp.float32)

    fan_in = Cin * KH * KW
    weight = jax.random.uniform(kw, (Cout, Cin, KH, KW), dtype=jnp.float32,
                                minval=-1.0, maxval=1.0) / jnp.sqrt(fan_in)
    gamma = jnp.ones((Cout,), jnp.float32)
    beta = jnp.zeros((Cout,), jnp.float32)
    alpha = jnp.full((Cout,), 0.2, jnp.float32)   # LeakyReLU(0.2); PReLU init = 0.25

    fwd_f32 = jax.jit(functools.partial(conv_layer_forward, mxu_dtype=jnp.float32))
    fwd_bf16 = jax.jit(conv_layer_forward)
    fwd_f32_s2 = jax.jit(functools.partial(conv_layer_forward, stride=2,
                                           mxu_dtype=jnp.float32))

    # 1) f32 MXU operands + f32 intermediates, stride=1: tight check vs reference.
    out = jax.block_until_ready(fwd_f32(x, weight, gamma, beta, alpha))
    ref = jax.block_until_ready(reference_forward(x, weight, gamma, beta, alpha))
    assert out.shape == (N, Cout, H, W)
    err = jnp.max(jnp.abs(out - ref))
    assert jnp.allclose(out, ref, atol=1e-4, rtol=1e-4), f"f32 mismatch: {err}"

    # 2) bf16 MXU operands + bf16 stored intermediates (default fast path) vs a
    #    reference on bf16-quantized inputs.  Tolerance reflects bf16 storage of the
    #    pre-BN intermediate and of the output slab (math itself is f32).
    out_bf = jax.block_until_ready(fwd_bf16(x, weight, gamma, beta, alpha))
    xq = x.astype(jnp.bfloat16).astype(jnp.float32)
    wq = weight.astype(jnp.bfloat16).astype(jnp.float32)
    ref_bf = jax.block_until_ready(reference_forward(xq, wq, gamma, beta, alpha))
    err_bf = jnp.max(jnp.abs(out_bf - ref_bf))
    assert jnp.allclose(out_bf, ref_bf, atol=3e-2, rtol=3e-2), f"bf16 mismatch: {err_bf}"

    # 3) stride=2 block (SRGAN discriminator downsampling), f32 path.
    out_s2 = jax.block_until_ready(fwd_f32_s2(x, weight, gamma, beta, alpha))
    ref_s2 = jax.block_until_ready(
        reference_forward(x, weight, gamma, beta, alpha, stride=2))
    assert out_s2.shape == (N, Cout, H // 2, W // 2)
    err_s2 = jnp.max(jnp.abs(out_s2 - ref_s2))
    assert jnp.allclose(out_s2, ref_s2, atol=1e-4, rtol=1e-4), f"stride2 mismatch: {err_s2}"

    print("KERNEL_OK")
</pallas_src>

<mosaic_0001>
module attributes {stable_mosaic.version = 11 : i64} {
  func.func @_conv_stats_kernel(%arg0: i32, %arg1: memref<256x128xf32, #tpu.memory_space<vmem>>, %arg2: memref<128x128xf32, #tpu.memory_space<vmem>>, %arg3: memref<256x128xf32, #tpu.memory_space<vmem>>, %arg4: memref<1x1x128xf32, #tpu.memory_space<vmem>>, %arg5: memref<1x1x128xf32, #tpu.memory_space<vmem>>) attributes {dimension_semantics = [#tpu.dimension_semantics<parallel>], iteration_bounds = array<i64: 2>, scalar_prefetch = 0 : i64, scratch_operands = 0 : i64, tpu.core_type = #tpu.core_type<tc>, window_params = [{transform_indices = @transform_0, window_bounds = array<i64: 256, 128>}, {pipeline_mode = #tpu.pipeline_mode<synchronous>, transform_indices = @transform_1, window_bounds = array<i64: 128, 128>}, {transform_indices = @transform_2, window_bounds = array<i64: 256, 128>}, {transform_indices = @transform_3, window_bounds = array<i64: 1, 1, 128>}, {transform_indices = @transform_4, window_bounds = array<i64: 1, 1, 128>}]} {
    %c0 = arith.constant 0 : index
    %c0_0 = arith.constant 0 : index
    %0 = vector.load %arg1[%c0, %c0_0] : memref<256x128xf32, #tpu.memory_space<vmem>>, vector<256x128xf32>
    %c0_1 = arith.constant 0 : index
    %c0_2 = arith.constant 0 : index
    %1 = vector.load %arg2[%c0_1, %c0_2] : memref<128x128xf32, #tpu.memory_space<vmem>>, vector<128x128xf32>
    %cst = arith.constant dense<0.000000e+00> : vector<256x128xf32>
    %2 = tpu.matmul %0, %1, %cst {dimension_numbers = #tpu.dot_dimension_numbers<[1], [0], [0], [1], [0, 0, 1, 1], [], []>} : vector<256x128xf32>, vector<128x128xf32>, vector<256x128xf32> -> vector<256x128xf32>
    %c0_3 = arith.constant 0 : index
    %c0_4 = arith.constant 0 : index
    %3 = vector.load %arg3[%c0_3, %c0_4] : memref<256x128xf32, #tpu.memory_space<vmem>>, vector<256x128xf32>
    tpu.vector_store %arg3[%c0_3, %c0_4], %2 {strides = array<i32>} : memref<256x128xf32, #tpu.memory_space<vmem>>, vector<256x128xf32>,
    %cst_5 = arith.constant dense<0.000000e+00> : vector<128xf32>
    %4 = vector.multi_reduction <add>, %2, %cst_5 [0] : vector<256x128xf32> to vector<128xf32>
    %5 = vector.shape_cast %4 : vector<128xf32> to vector<1x1x128xf32>
    %c0_6 = arith.constant 0 : index
    %c0_7 = arith.constant 0 : index
    %c0_8 = arith.constant 0 : index
    %6 = vector.load %arg4[%c0_6, %c0_7, %c0_8] : memref<1x1x128xf32, #tpu.memory_space<vmem>>, vector<1x1x128xf32>
    tpu.vector_store %arg4[%c0_6, %c0_7, %c0_8], %5 {strides = array<i32>} : memref<1x1x128xf32, #tpu.memory_space<vmem>>, vector<1x1x128xf32>,
    %7 = arith.mulf %2, %2 : vector<256x128xf32>
    %cst_9 = arith.constant dense<0.000000e+00> : vector<128xf32>
    %8 = vector.multi_reduction <add>, %7, %cst_9 [0] : vector<256x128xf32> to vector<128xf32>
    %9 = vector.shape_cast %8 : vector<128xf32> to vector<1x1x128xf32>
    %c0_10 = arith.constant 0 : index
    %c0_11 = arith.constant 0 : index
    %c0_12 = arith.constant 0 : index
    %10 = vector.load %arg5[%c0_10, %c0_11, %c0_12] : memref<1x1x128xf32, #tpu.memory_space<vmem>>, vector<1x1x128xf32>
    tpu.vector_store %arg5[%c0_10, %c0_11, %c0_12], %9 {strides = array<i32>} : memref<1x1x128xf32, #tpu.memory_space<vmem>>, vector<1x1x128xf32>,
    return
  }
  func.func @transform_0(%arg0: i32) -> (i32, i32) {
    %c0_i32 = arith.constant 0 : i32
    %c0_i32_0 = arith.constant 0 : i32
    return %arg0, %c0_i32 : i32, i32
  }
  func.func @transform_1(%arg0: i32) -> (i32, i32) {
    %c0_i32 = arith.constant 0 : i32
    %c0_i32_0 = arith.constant 0 : i32
    %c0_i32_1 = arith.constant 0 : i32
    return %c0_i32, %c0_i32_0 : i32, i32
  }
  func.func @transform_2(%arg0: i32) -> (i32, i32) {
    %c0_i32 = arith.constant 0 : i32
    %c0_i32_0 = arith.constant 0 : i32
    return %arg0, %c0_i32 : i32, i32
  }
  func.func @transform_3(%arg0: i32) -> (i32, i32, i32) {
    %c0_i32 = arith.constant 0 : i32
    %c0_i32_0 = arith.constant 0 : i32
    %c0_i32_1 = arith.constant 0 : i32
    return %arg0, %c0_i32, %c0_i32_0 : i32, i32, i32
  }
  func.func @transform_4(%arg0: i32) -> (i32, i32, i32) {
    %c0_i32 = arith.constant 0 : i32
    %c0_i32_0 = arith.constant 0 : i32
    %c0_i32_1 = arith.constant 0 : i32
    return %arg0, %c0_i32, %c0_i32_0 : i32, i32, i32
  }
}

module attributes {stable_mosaic.version = 11 : i64} {
  func.func @_bn_act_kernel(%arg0: i32, %arg1: memref<256x128xf32, #tpu.memory_space<vmem>>, %arg2: memref<3x128xf32, #tpu.memory_space<vmem>>, %arg3: memref<256x128xf32, #tpu.memory_space<vmem>>) attributes {dimension_semantics = [#tpu.dimension_semantics<parallel>], iteration_bounds = array<i64: 2>, scalar_prefetch = 0 : i64, scratch_operands = 0 : i64, tpu.core_type = #tpu.core_type<tc>, window_params = [{transform_indices = @transform_0, window_bounds = array<i64: 256, 128>}, {pipeline_mode = #tpu.pipeline_mode<synchronous>, transform_indices = @transform_1, window_bounds = array<i64: 3, 128>}, {transform_indices = @transform_2, window_bounds = array<i64: 256, 128>}]} {
    %c0 = arith.constant 0 : index
    %c0_0 = arith.constant 0 : index
    %0 = vector.load %arg1[%c0, %c0_0] : memref<256x128xf32, #tpu.memory_space<vmem>>, vector<256x128xf32>
    %c0_1 = arith.constant 0 : index
    %c0_2 = arith.constant 0 : index
    %1 = vector.load %arg2[%c0_1, %c0_2] : memref<3x128xf32, #tpu.memory_space<vmem>>, vector<1x128xf32>
    %2 = vector.broadcast %1 : vector<1x128xf32> to vector<256x128xf32>
    %3 = arith.mulf %0, %2 : vector<256x128xf32>
    %c1 = arith.constant 1 : index
    %c0_3 = arith.constant 0 : index
    %4 = vector.load %arg2[%c1, %c0_3] : memref<3x128xf32, #tpu.memory_space<vmem>>, vector<1x128xf32>
    %5 = vector.broadcast %4 : vector<1x128xf32> to vector<256x128xf32>
    %6 = arith.addf %3, %5 : vector<256x128xf32>
    %cst = arith.constant 0.000000e+00 : f32
    %7 = vector.broadcast %cst : f32 to vector<256x128xf32>
    %8 = arith.cmpf ogt, %6, %7 : vector<256x128xf32>
    %c2 = arith.constant 2 : index
    %c0_4 = arith.constant 0 : index
    %9 = vector.load %arg2[%c2, %c0_4] : memref<3x128xf32, #tpu.memory_space<vmem>>, vector<1x128xf32>
    %10 = vector.broadcast %9 : vector<1x128xf32> to vector<256x128xf32>
    %11 = arith.mulf %10, %6 : vector<256x128xf32>
    %12 = arith.select %8, %6, %11 : vector<256x128xi1>, vector<256x128xf32>
    %c0_5 = arith.constant 0 : index
    %c0_6 = arith.constant 0 : index
    %13 = vector.load %arg3[%c0_5, %c0_6] : memref<256x128xf32, #tpu.memory_space<vmem>>, vector<256x128xf32>
    tpu.vector_store %arg3[%c0_5, %c0_6], %12 {strides = array<i32>} : memref<256x128xf32, #tpu.memory_space<vmem>>, vector<256x128xf32>,
    return
  }
  func.func @transform_0(%arg0: i32) -> (i32, i32) {
    %c0_i32 = arith.constant 0 : i32
    %c0_i32_0 = arith.constant 0 : i32
    return %arg0, %c0_i32 : i32, i32
  }
  func.func @transform_1(%arg0: i32) -> (i32, i32) {
    %c0_i32 = arith.constant 0 : i32
    %c0_i32_0 = arith.constant 0 : i32
    %c0_i32_1 = arith.constant 0 : i32
    return %c0_i32, %c0_i32_0 : i32, i32
  }
  func.func @transform_2(%arg0: i32) -> (i32, i32) {
    %c0_i32 = arith.constant 0 : i32
    %c0_i32_0 = arith.constant 0 : i32
    return %arg0, %c0_i32 : i32, i32
  }
}

</mosaic_0001>

<bundles_post_ra>
// kernel: conv_layer_forward.3
= control target key start
LH: loop header
LB: loop body
LE: loop exit
PB: predicated region body
PF: predicated region fallthrough
CT: control target
= control target key end

     0   :  { %s487_s9 = smov 0   ;;  %s747_s0 = inlined_call_operand.vmem [shape: f32[512,128], index: 0, kind: input, shape index: {}, may-alias: {0,2}]   ;;  %s748_s1 = inlined_call_operand.vmem [shape: f32[3,128], index: 1, kind: input, shape index: {}]   ;;  %s749_s2 = inlined_call_operand.vmem [shape: f32[512,128], index: 2, kind: output, shape index: {}, may-alias: {0,2}]  }
   0x1 LB: > { %s442_s10 = sadd.s32 4294967295, %s470_s9   ;;  %p446_p0 = scmp.ge.s32.totalorder %s470_s9, 1  ;;  %s470_s9 = sphi %s487_s9, %s12_s9  }
   0x2   : > { %p113_p1 = scmp.lt.s32.totalorder %s470_s9, 3 }
   0x4   : > { %p114_p2 = pnand %p446_p0, %p113_p1 }
   0x5   : > { %s447_s11 = sshll.u32 (!%p114_p2), %s442_s10, 5 }
   0x6   : > { %117 = sbr.rel (%p114_p2) target bundleno = 60 (0x3c), region = 28  ;;  %p136_p3 = scmp.lt.s32.totalorder (!%p114_p2), %s447_s11, 63 }
   0xb   : > { %s751_s11 = smov (!%p136_p3, %s447_s11), 63  ;;  %v501_v0 = vld [vmem:[%s748_s1] ss:$0 sm:$0xff]  ;;  %v513_v1 = vld [vmem:[%s748_s1 + $0x1] ss:$0 sm:$0xff] }
   0xc   : > { %s448_s12 = sshll.u32 %s751_s11, 3  ;;  %v529_v13 = vld [vmem:[%s748_s1 + $0x2] ss:$0 sm:$0xff] }
   0xd   : > { %s508_s17 = scalar_lea.vmem %s747_s0, %s448_s12  ;;  %s556_s24 = scalar_lea.vmem %s749_s2, %s448_s12 }
   0xe   : > { %v147_v2 = vld [vmem:[%s508_s17] sm:$0xff]  ;;  %v148_v3 = vld [vmem:[%s508_s17 + $0x8] sm:$0xff]  ;;  %v149_v4 = vld [vmem:[%s508_s17 + $0x10] sm:$0xff] }
   0xf   : > { %v150_v5 = vld [vmem:[%s508_s17 + $0x18] sm:$0xff]  ;;  %v151_v6 = vld [vmem:[%s508_s17 + $0x20] sm:$0xff]  ;;  %v152_v7 = vld [vmem:[%s508_s17 + $0x28] sm:$0xff]  ;;  %v184_v8 = vmul.f32 %v501_v0, %v147_v2  ;;  %v185_v9 = vmul.f32 %v501_v0, %v148_v3  ;;  %v186_v10 = vmul.f32 %v501_v0, %v149_v4 }
  0x10   : > { %v153_v11 = vld [vmem:[%s508_s17 + $0x30] sm:$0xff]  ;;  %v154_v12 = vld [vmem:[%s508_s17 + $0x38] sm:$0xff]  ;;  %v187_v14 = vmul.f32 %v501_v0, %v150_v5  ;;  %v188_v15 = vmul.f32 %v501_v0, %v151_v6  ;;  %v189_v16 = vmul.f32 %v501_v0, %v152_v7  ;;  %v155_v27 = vld [vmem:[%s508_s17 + $0x40] sm:$0xff] }
  0x11   : > { %v221_v17 = vadd.f32 %v513_v1, %v184_v8  ;;  %v222_v18 = vadd.f32 %v513_v1, %v185_v9  ;;  %v223_v19 = vadd.f32 %v513_v1, %v186_v10  ;;  %v190_v20 = vmul.f32 %v501_v0, %v153_v11  ;;  %v156_v30 = vld [vmem:[%s508_s17 + $0x48] sm:$0xff]  ;;  %v157_v31 = vld [vmem:[%s508_s17 + $0x50] sm:$0xff]  ;;  %v158_v32 = vld [vmem:[%s508_s17 + $0x58] sm:$0xff] }
  0x12   : > { %v224_v21 = vadd.f32 %v513_v1, %v187_v14  ;;  %v225_v22 = vadd.f32 %v513_v1, %v188_v15  ;;  %v226_v23 = vadd.f32 %v513_v1, %v189_v16  ;;  %v191_v24 = vmul.f32 %v501_v0, %v154_v12  ;;  %v159_v36 = vld [vmem:[%s508_s17 + $0x60] sm:$0xff]  ;;  %v160_v37 = vld [vmem:[%s508_s17 + $0x68] sm:$0xff]  ;;  %v561_v38 = vld [vmem:[%s508_s17 + $0x70] sm:$0xff] }
  0x13   : > { %vm253_vm0 = vcmp.gt.f32.partialorder %v221_v17, 0.0  ;;  %v290_v25 = vmul.f32 %v529_v13, %v221_v17  ;;  %vm254_vm1 = vcmp.gt.f32.partialorder %v222_v18, 0.0  ;;  %v291_v26 = vmul.f32 %v529_v13, %v222_v18  ;;  %v564_v39 = vld [vmem:[%s508_s17 + $0x78] sm:$0xff]  ;;  %v567_v40 = vld [vmem:[%s508_s17 + $0x80] sm:$0xff]  ;;  %v570_v41 = vld [vmem:[%s508_s17 + $0x88] sm:$0xff] }
  0x14   : > { %vm255_vm2 = vcmp.gt.f32.partialorder %v223_v19, 0.0  ;;  %v292_v28 = vmul.f32 %v529_v13, %v223_v19  ;;  %vm256_vm3 = vcmp.gt.f32.partialorder %v224_v21, 0.0  ;;  %v293_v29 = vmul.f32 %v529_v13, %v224_v21  ;;  %v573_v42 = vld [vmem:[%s508_s17 + $0x90] sm:$0xff]  ;;  %v576_v43 = vld [vmem:[%s508_s17 + $0x98] sm:$0xff]  ;;  %v579_v44 = vld [vmem:[%s508_s17 + $0xa0] sm:$0xff] }
  0x15   : > { %v322_v33 = vsel %vm253_vm0, %v221_v17, %v290_v25  ;;  %v323_v34 = vsel %vm254_vm1, %v222_v18, %v291_v26  ;;  %vm257_vm4 = vcmp.gt.f32.partialorder %v225_v22, 0.0  ;;  %v294_v35 = vmul.f32 %v529_v13, %v225_v22  ;;  %v582_v45 = vld [vmem:[%s508_s17 + $0xa8] sm:$0xff]  ;;  %v585_v46 = vld [vmem:[%s508_s17 + $0xb0] sm:$0xff]  ;;  %v588_v47 = vld [vmem:[%s508_s17 + $0xb8] sm:$0xff] }
  0x16   : > { %v591_v48 = vld [vmem:[%s508_s17 + $0xc0] sm:$0xff]  ;;  %v594_v49 = vld [vmem:[%s508_s17 + $0xc8] sm:$0xff]  ;;  %v324_v50 = vsel %vm255_vm2, %v223_v19, %v292_v28  ;;  %v325_v51 = vsel %vm256_vm3, %v224_v21, %v293_v29  ;;  %vm258_vm5 = vcmp.gt.f32.partialorder %v226_v23, 0.0  ;;  %v295_v52 = vmul.f32 %v529_v13, %v226_v23  ;;  %v600_v53 = vld [vmem:[%s508_s17 + $0xd0] sm:$0xff] }
  0x17   : > { %v603_v54 = vld [vmem:[%s508_s17 + $0xd8] sm:$0xff]  ;;  %v606_v55 = vld [vmem:[%s508_s17 + $0xe0] sm:$0xff]  ;;  %v326_v56 = vsel %vm257_vm4, %v225_v22, %v294_v35  ;;  %v227_v57 = vadd.f32 %v513_v1, %v190_v20  ;;  %v228_v58 = vadd.f32 %v513_v1, %v191_v24  ;;  %v192_v59 = vmul.f32 %v501_v0, %v155_v27  ;;  %v613_v60 = vld [vmem:[%s508_s17 + $0xe8] sm:$0xff] }
  0x18   : > { %v616_v61 = vld [vmem:[%s508_s17 + $0xf0] sm:$0xff]  ;;  %v619_v62 = vld [vmem:[%s508_s17 + $0xf8] sm:$0xff]  ;;  %v327_v63 = vsel %vm258_vm5, %v226_v23, %v295_v52  ;;  %v193_v2 = vmul.f32 %v501_v0, %v156_v30  ;;  %v194_v3 = vmul.f32 %v501_v0, %v157_v31  ;;  %v195_v4 = vmul.f32 %v501_v0, %v158_v32 }
  0x19   : > { %354 = vst [vmem:[%s556_s24] sm:$0xff] %v322_v33  ;;  %355 = vst [vmem:[%s556_s24 + $0x8] sm:$0xff] %v323_v34  ;;  %vm259_vm6 = vcmp.gt.f32.partialorder %v227_v57, 0.0  ;;  %v296_v5 = vmul.f32 %v529_v13, %v227_v57  ;;  %vm260_vm7 = vcmp.gt.f32.partialorder %v228_v58, 0.0  ;;  %v297_v6 = vmul.f32 %v529_v13, %v228_v58 }
  0x1a   : > { %356 = vst [vmem:[%s556_s24 + $0x10] sm:$0xff] %v324_v50  ;;  %357 = vst [vmem:[%s556_s24 + $0x18] sm:$0xff] %v325_v51  ;;  %v229_v7 = vadd.f32 %v513_v1, %v192_v59  ;;  %v230_v8 = vadd.f32 %v513_v1, %v193_v2  ;;  %v231_v9 = vadd.f32 %v513_v1, %v194_v3 }
  0x1b   : > { %358 = vst [vmem:[%s556_s24 + $0x20] sm:$0xff] %v326_v56  ;;  %359 = vst [vmem:[%s556_s24 + $0x28] sm:$0xff] %v327_v63  ;;  %v232_v10 = vadd.f32 %v513_v1, %v195_v4  ;;  %v328_v11 = vsel %vm259_vm6, %v227_v57, %v296_v5  ;;  %v329_v12 = vsel %vm260_vm7, %v228_v58, %v297_v6 }
  0x1c   : > { %v196_v14 = vmul.f32 %v501_v0, %v159_v36  ;;  %v197_v15 = vmul.f32 %v501_v0, %v160_v37  ;;  %360 = vst [vmem:[%s556_s24 + $0x30] sm:$0xff] %v328_v11  ;;  %361 = vst [vmem:[%s556_s24 + $0x38] sm:$0xff] %v329_v12  ;;  %vm261_vm8 = vcmp.gt.f32.partialorder %v229_v7, 0.0  ;;  %v298_v16 = vmul.f32 %v529_v13, %v229_v7 }
  0x1d   : > { %vm262_vm9 = vcmp.gt.f32.partialorder %v230_v8, 0.0  ;;  %v299_v17 = vmul.f32 %v529_v13, %v230_v8  ;;  %vm263_vm10 = vcmp.gt.f32.partialorder %v231_v9, 0.0  ;;  %v300_v18 = vmul.f32 %v529_v13, %v231_v9 }
  0x1e   : > { %vm264_vm11 = vcmp.gt.f32.partialorder %v232_v10, 0.0  ;;  %v301_v19 = vmul.f32 %v529_v13, %v232_v10  ;;  %v330_v20 = vsel %vm261_vm8, %v229_v7, %v298_v16  ;;  %v233_v22 = vadd.f32 %v513_v1, %v196_v14 }
  0x1f   : > { %v331_v21 = vsel %vm262_vm9, %v230_v8, %v299_v17  ;;  %v234_v23 = vadd.f32 %v513_v1, %v197_v15  ;;  %362 = vst [vmem:[%s556_s24 + $0x40] sm:$0xff] %v330_v20  ;;  %v332_v24 = vsel %vm263_vm10, %v231_v9, %v300_v18  ;;  %v198_v26 = vmul.f32 %v501_v0, %v561_v38 }
  0x20   : > { %363 = vst [vmem:[%s556_s24 + $0x48] sm:$0xff] %v331_v21  ;;  %v333_v25 = vsel %vm264_vm11, %v232_v10, %v301_v19  ;;  %v199_v27 = vmul.f32 %v501_v0, %v564_v39  ;;  %364 = vst [vmem:[%s556_s24 + $0x50] sm:$0xff] %v332_v24  ;;  %vm265_vm12 = vcmp.gt.f32.partialorder %v233_v22, 0.0  ;;  %v302_v28 = vmul.f32 %v529_v13, %v233_v22 }
  0x21   : > { %365 = vst [vmem:[%s556_s24 + $0x58] sm:$0xff] %v333_v25  ;;  %vm266_vm13 = vcmp.gt.f32.partialorder %v234_v23, 0.0  ;;  %v303_v29 = vmul.f32 %v529_v13, %v234_v23  ;;  %v235_v30 = vadd.f32 %v513_v1, %v198_v26  ;;  %v200_v32 = vmul.f32 %v501_v0, %v567_v40 }
  0x22   : > { %v236_v31 = vadd.f32 %v513_v1, %v199_v27  ;;  %v201_v33 = vmul.f32 %v501_v0, %v570_v41  ;;  %v334_v34 = vsel %vm265_vm12, %v233_v22, %v302_v28  ;;  %v202_v36 = vmul.f32 %v501_v0, %v573_v42 }
  0x23   : > { %v335_v35 = vsel %vm266_vm13, %v234_v23, %v303_v29  ;;  %v203_v37 = vmul.f32 %v501_v0, %v576_v43  ;;  %366 = vst [vmem:[%s556_s24 + $0x60] sm:$0xff] %v334_v34  ;;  %vm267_vm14 = vcmp.gt.f32.partialorder %v235_v30, 0.0  ;;  %v304_v38 = vmul.f32 %v529_v13, %v235_v30 }
  0x24   : > { %367 = vst [vmem:[%s556_s24 + $0x68] sm:$0xff] %v335_v35  ;;  %vm268_vm15 = vcmp.gt.f32.partialorder %v236_v31, 0.0  ;;  %v305_v39 = vmul.f32 %v529_v13, %v236_v31  ;;  %v237_v40 = vadd.f32 %v513_v1, %v200_v32  ;;  %v238_v41 = vadd.f32 %v513_v1, %v201_v33 }
  0x25   : > { %v239_v50 = vadd.f32 %v513_v1, %v202_v36  ;;  %v240_v42 = vadd.f32 %v513_v1, %v203_v37  ;;  %v336_v51 = vsel %vm267_vm14, %v235_v30, %v304_v38  ;;  %v204_v43 = vmul.f32 %v501_v0, %v579_v44 }
  0x26   : > { %v337_v52 = vsel %vm268_vm15, %v236_v31, %v305_v39  ;;  %v205_v56 = vmul.f32 %v501_v0, %v582_v45  ;;  %368 = vst [vmem:[%s556_s24 + $0x70] sm:$0xff] %v336_v51  ;;  %vm269_vm0 = vcmp.gt.f32.partialorder %v237_v40, 0.0  ;;  %v306_v57 = vmul.f32 %v529_v13, %v237_v40 }
  0x27   : > { %369 = vst [vmem:[%s556_s24 + $0x78] sm:$0xff] %v337_v52  ;;  %vm270_vm1 = vcmp.gt.f32.partialorder %v238_v41, 0.0  ;;  %v307_v58 = vmul.f32 %v529_v13, %v238_v41  ;;  %vm271_vm2 = vcmp.gt.f32.partialorder %v239_v50, 0.0  ;;  %v308_v59 = vmul.f32 %v529_v13, %v239_v50 }
  0x28   : > { %vm272_vm3 = vcmp.gt.f32.partialorder %v240_v42, 0.0  ;;  %v309_v44 = vmul.f32 %v529_v13, %v240_v42  ;;  %v338_v63 = vsel %vm269_vm0, %v237_v40, %v306_v57  ;;  %v241_v45 = vadd.f32 %v513_v1, %v204_v43 }
  0x29   : > { %v339_v2 = vsel %vm270_vm1, %v238_v41, %v307_v58  ;;  %v242_v3 = vadd.f32 %v513_v1, %v205_v56  ;;  %370 = vst [vmem:[%s556_s24 + $0x80] sm:$0xff] %v338_v63  ;;  %v340_v4 = vsel %vm271_vm2, %v239_v50, %v308_v59  ;;  %v206_v6 = vmul.f32 %v501_v0, %v585_v46 }
  0x2a   : > { %371 = vst [vmem:[%s556_s24 + $0x88] sm:$0xff] %v339_v2  ;;  %v341_v5 = vsel %vm272_vm3, %v240_v42, %v309_v44  ;;  %v207_v7 = vmul.f32 %v501_v0, %v588_v47  ;;  %372 = vst [vmem:[%s556_s24 + $0x90] sm:$0xff] %v340_v4  ;;  %vm273_vm4 = vcmp.gt.f32.partialorder %v241_v45, 0.0  ;;  %v310_v8 = vmul.f32 %v529_v13, %v241_v45 }
  0x2b   : > { %373 = vst [vmem:[%s556_s24 + $0x98] sm:$0xff] %v341_v5  ;;  %vm274_vm5 = vcmp.gt.f32.partialorder %v242_v3, 0.0  ;;  %v311_v9 = vmul.f32 %v529_v13, %v242_v3  ;;  %v243_v10 = vadd.f32 %v513_v1, %v206_v6  ;;  %v208_v46 = vmul.f32 %v501_v0, %v591_v48 }
  0x2c   : > { %v244_v11 = vadd.f32 %v513_v1, %v207_v7  ;;  %v209_v12 = vmul.f32 %v501_v0, %v594_v49  ;;  %v342_v47 = vsel %vm273_vm4, %v241_v45, %v310_v8  ;;  %v210_v15 = vmul.f32 %v501_v0, %v600_v53 }
  0x2d   : > { %v343_v14 = vsel %vm274_vm5, %v242_v3, %v311_v9  ;;  %v211_v16 = vmul.f32 %v501_v0, %v603_v54  ;;  %374 = vst [vmem:[%s556_s24 + $0xa0] sm:$0xff] %v342_v47  ;;  %vm275_vm6 = vcmp.gt.f32.partialorder %v243_v10, 0.0  ;;  %v312_v17 = vmul.f32 %v529_v13, %v243_v10 }
  0x2e   : > { %375 = vst [vmem:[%s556_s24 + $0xa8] sm:$0xff] %v343_v14  ;;  %vm276_vm7 = vcmp.gt.f32.partialorder %v244_v11, 0.0  ;;  %v313_v48 = vmul.f32 %v529_v13, %v244_v11  ;;  %v245_v49 = vadd.f32 %v513_v1, %v208_v46  ;;  %v246_v18 = vadd.f32 %v513_v1, %v209_v12 }
  0x2f   : > { %v247_v19 = vadd.f32 %v513_v1, %v210_v15  ;;  %v248_v53 = vadd.f32 %v513_v1, %v211_v16  ;;  %v344_v20 = vsel %vm275_vm6, %v243_v10, %v312_v17  ;;  %v212_v54 = vmul.f32 %v501_v0, %v606_v55 }
  0x30   : > { %v345_v21 = vsel %vm276_vm7, %v244_v11, %v313_v48  ;;  %v213_v22 = vmul.f32 %v501_v0, %v613_v60  ;;  %376 = vst [vmem:[%s556_s24 + $0xb0] sm:$0xff] %v344_v20  ;;  %vm277_vm8 = vcmp.gt.f32.partialorder %v245_v49, 0.0  ;;  %v314_v23 = vmul.f32 %v529_v13, %v245_v49 }
  0x31   : > { %377 = vst [vmem:[%s556_s24 + $0xb8] sm:$0xff] %v345_v21  ;;  %vm278_vm9 = vcmp.gt.f32.partialorder %v246_v18, 0.0  ;;  %v315_v24 = vmul.f32 %v529_v13, %v246_v18  ;;  %vm279_vm10 = vcmp.gt.f32.partialorder %v247_v19, 0.0  ;;  %v316_v25 = vmul.f32 %v529_v13, %v247_v19 }
  0x32   : > { %vm280_vm11 = vcmp.gt.f32.partialorder %v248_v53, 0.0  ;;  %v317_v55 = vmul.f32 %v529_v13, %v248_v53  ;;  %v346_v26 = vsel %vm277_vm8, %v245_v49, %v314_v23  ;;  %v249_v60 = vadd.f32 %v513_v1, %v212_v54 }
  0x33   : > { %v347_v27 = vsel %vm278_vm9, %v246_v18, %v315_v24  ;;  %v250_v28 = vadd.f32 %v513_v1, %v213_v22  ;;  %378 = vst [vmem:[%s556_s24 + $0xc0] sm:$0xff] %v346_v26  ;;  %v348_v29 = vsel %vm279_vm10, %v247_v19, %v316_v25  ;;  %v214_v31 = vmul.f32 %v501_v0, %v616_v61 }
  0x34   : > { %379 = vst [vmem:[%s556_s24 + $0xc8] sm:$0xff] %v347_v27  ;;  %v349_v30 = vsel %vm280_vm11, %v248_v53, %v317_v55  ;;  %v215_v32 = vmul.f32 %v501_v0, %v619_v62  ;;  %380 = vst [vmem:[%s556_s24 + $0xd0] sm:$0xff] %v348_v29  ;;  %vm281_vm12 = vcmp.gt.f32.partialorder %v249_v60, 0.0  ;;  %v318_v33 = vmul.f32 %v529_v13, %v249_v60 }
  0x35   : > { %381 = vst [vmem:[%s556_s24 + $0xd8] sm:$0xff] %v349_v30  ;;  %vm282_vm13 = vcmp.gt.f32.partialorder %v250_v28, 0.0  ;;  %v319_v34 = vmul.f32 %v529_v13, %v250_v28  ;;  %v251_v35 = vadd.f32 %v513_v1, %v214_v31 }
  0x36   : > { %v252_v36 = vadd.f32 %v513_v1, %v215_v32  ;;  %v350_v37 = vsel %vm281_vm12, %v249_v60, %v318_v33 }
  0x37   : > { %v351_v38 = vsel %vm282_vm13, %v250_v28, %v319_v34  ;;  %382 = vst [vmem:[%s556_s24 + $0xe0] sm:$0xff] %v350_v37  ;;  %vm283_vm14 = vcmp.gt.f32.partialorder %v251_v35, 0.0  ;;  %v320_v0 = vmul.f32 %v529_v13, %v251_v35 }
  0x38   : > { %383 = vst [vmem:[%s556_s24 + $0xe8] sm:$0xff] %v351_v38  ;;  %vm284_vm15 = vcmp.gt.f32.partialorder %v252_v36, 0.0  ;;  %v321_v61 = vmul.f32 %v529_v13, %v252_v36 }
  0x39   : > { %v352_v62 = vsel %vm283_vm14, %v251_v35, %v320_v0 }
  0x3a   : > { %v353_v39 = vsel %vm284_vm15, %v252_v36, %v321_v61  ;;  %384 = vst [vmem:[%s556_s24 + $0xf0] sm:$0xff] %v352_v62 }
  0x3b   : > { %385 = vst [vmem:[%s556_s24 + $0xf8] sm:$0xff] %v353_v39 }
  0x3c PF: > { %s12_s9 = sadd.s32 1, %s470_s9  }
  0x3d   : > { %p9_p4 = scmp.ge.s32.totalorder %s12_s9, 4  }
  0x3f   :  { %11 = sbr.rel (!%p9_p4) target bundleno = 1 (0x1), region = 58 }

// kernel: conv_layer_forward.2
= control target key start
LH: loop header
LB: loop body
LE: loop exit
PB: predicated region body
PF: predicated region fallthrough
CT: control target
= control target key end

     0   :  { %s949_s15 = smov 0   ;;  %s1172_s0 = inlined_call_operand.vmem [shape: f32[512,128], index: 0, kind: input, shape index: {}]   ;;  %s1173_s1 = inlined_call_operand.vmem [shape: f32[128,128], index: 1, kind: input, shape index: {}]   ;;  %s1174_s2 = inlined_call_operand.vmem [shape: f32[512,128], index: 2, kind: output, shape index: {0}]   ;;  %s1175_s3 = inlined_call_operand.vmem [shape: f32[2,1,128], index: 3, kind: output, shape index: {1}]   ;;  %s1176_s4 = inlined_call_operand.vmem [shape: f32[2,1,128], index: 4, kind: output, shape index: {2}]  }
   0x1 LB: > { %s955_s16 = sadd.s32 4294967295, %s922_s15   ;;  %p741_p0 = scmp.ge.s32.totalorder %s922_s15, 1  ;;  %s922_s15 = sphi %s949_s15, %s15_s15  }
   0x2   : > { %p168_p1 = scmp.lt.s32.totalorder %s922_s15, 3 }
   0x4   : > { %p169_p2 = pnand %p741_p0, %p168_p1 }
   0x5   : > { %s742_s21 = sshll.u32 (!%p169_p2), %s955_s16, 5  ;;  %p212_p4 = scmp.lt.s32.totalorder (!%p169_p2), %s955_s16, 1 }
   0x6   : > { %172 = sbr.rel (%p169_p2) target bundleno = 318 (0x13e), region = 28  ;;  %p201_p3 = scmp.lt.s32.totalorder (!%p169_p2), %s742_s21, 63 }
   0xb   : > { %v265_v0 = vld [vmem:[%s1173_s1 + $0x78] sm:$0xff]  ;;  %v264_v1 = vld [vmem:[%s1173_s1 + $0x70] sm:$0xff]  ;;  %v263_v2 = vld [vmem:[%s1173_s1 + $0x68] sm:$0xff]  ;;  %s1178_s21 = smov (!%p201_p3, %s742_s21), 63  ;;  %s1180_s16 = smov (!%p212_p4, %s955_s16), 1 }
   0xc   : > { %796 = vmatprep.subr.mxu0 %v265_v0  ;;  %876 = vmatprep.subr.mxu1 %v265_v0  ;;  %v262_v3 = vld [vmem:[%s1173_s1 + $0x60] sm:$0xff]  ;;  %s743_s26 = sshll.u32 %s1178_s21, 3  ;;  %v261_v4 = vld [vmem:[%s1173_s1 + $0x58] sm:$0xff]  ;;  %v260_v6 = vld [vmem:[%s1173_s1 + $0x50] sm:$0xff]  ;;  %s217_s12 = scalar_lea.vmem %s1176_s4, %s1180_s16 }
   0xd   : > { %797 = vmatpush3.msra.mxu0 %v265_v0  ;;  %892 = vmatpush3.msra.mxu1 %v265_v0  ;;  %s983_s5 = scalar_lea.vmem %s1172_s0, %s743_s26  ;;  %v259_v7 = vld [vmem:[%s1173_s1 + $0x48] sm:$0xff]  ;;  %v258_v8 = vld [vmem:[%s1173_s1 + $0x40] sm:$0xff]  ;;  %v257_v9 = vld [vmem:[%s1173_s1 + $0x38] sm:$0xff]  ;;  %s1055_s9 = scalar_lea.vmem %s1174_s2, %s743_s26 }
   0xe   : > { %798 = vmatprep.subr.mxu0 %v264_v1  ;;  %877 = vmatprep.subr.mxu1 %v264_v1  ;;  %v218_v5 = vld [vmem:[%s983_s5] sm:$0xff]  ;;  %v256_v10 = vld [vmem:[%s1173_s1 + $0x30] sm:$0xff]  ;;  %v255_v11 = vld [vmem:[%s1173_s1 + $0x28] sm:$0xff] }
   0xf   : > { %799 = vmatpush3.msra.mxu0 %v264_v1  ;;  %893 = vmatpush3.msra.mxu1 %v264_v1  ;;  %v254_v12 = vld [vmem:[%s1173_s1 + $0x20] sm:$0xff]  ;;  %v253_v13 = vld [vmem:[%s1173_s1 + $0x18] sm:$0xff]  ;;  %v252_v14 = vld [vmem:[%s1173_s1 + $0x10] sm:$0xff] }
  0x10   : > { %800 = vmatprep.subr.mxu0 %v263_v2  ;;  %878 = vmatprep.subr.mxu1 %v263_v2  ;;  %v251_v15 = vld [vmem:[%s1173_s1 + $0x8] sm:$0xff]  ;;  %v250_v16 = vld [vmem:[%s1173_s1] sm:$0xff]  ;;  %v220_v18 = vld [vmem:[%s983_s5 + $0x10] sm:$0xff] }
  0x11   : > { %801 = vmatpush3.msra.mxu0 %v263_v2  ;;  %894 = vmatpush3.msra.mxu1 %v263_v2  ;;  %v219_v17 = vld [vmem:[%s983_s5 + $0x8] sm:$0xff]  ;;  %v234_v19 = vld [vmem:[%s983_s5 + $0x80] sm:$0xff]  ;;  %v236_v21 = vld [vmem:[%s983_s5 + $0x90] sm:$0xff] }
  0x12   : > { %802 = vmatprep.subr.mxu0 %v262_v3  ;;  %879 = vmatprep.subr.mxu1 %v262_v3  ;;  %v235_v20 = vld [vmem:[%s983_s5 + $0x88] sm:$0xff]  ;;  %v221_v22 = vld [vmem:[%s983_s5 + $0x18] sm:$0xff]  ;;  %v222_v23 = vld [vmem:[%s983_s5 + $0x20] sm:$0xff] }
  0x13   : > { %803 = vmatpush3.msra.mxu0 %v262_v3  ;;  %828 = vmatprep.mubr.f32.mxu0 %v218_v5  ;;  %v237_v24 = vld [vmem:[%s983_s5 + $0x98] sm:$0xff]  ;;  %v238_v25 = vld [vmem:[%s983_s5 + $0xa0] sm:$0xff]  ;;  %v223_v26 = vld [vmem:[%s983_s5 + $0x28] sm:$0xff] }
  0x14   : > { %804 = vmatprep.subr.mxu0 %v261_v4  ;;  %895 = vmatpush3.msra.mxu1 %v262_v3  ;;  %v224_v27 = vld [vmem:[%s983_s5 + $0x30] sm:$0xff]  ;;  %v239_v28 = vld [vmem:[%s983_s5 + $0xa8] sm:$0xff]  ;;  %v225_v30 = vld [vmem:[%s983_s5 + $0x38] sm:$0xff] }
  0x15   : > { %805 = vmatpush3.msra.mxu0 %v261_v4  ;;  %880 = vmatprep.subr.mxu1 %v261_v4  ;;  %v240_v29 = vld [vmem:[%s983_s5 + $0xb0] sm:$0xff]  ;;  %v226_v31 = vld [vmem:[%s983_s5 + $0x40] sm:$0xff]  ;;  %v241_v32 = vld [vmem:[%s983_s5 + $0xb8] sm:$0xff] }
  0x16   : > { %806 = vmatprep.subr.mxu0 %v260_v6  ;;  %896 = vmatpush3.msra.mxu1 %v261_v4  ;;  %v242_v33 = vld [vmem:[%s983_s5 + $0xc0] sm:$0xff]  ;;  %v227_v34 = vld [vmem:[%s983_s5 + $0x48] sm:$0xff]  ;;  %v228_v35 = vld [vmem:[%s983_s5 + $0x50] sm:$0xff] }
  0x17   : > { %807 = vmatpush3.msra.mxu0 %v260_v6  ;;  %881 = vmatprep.subr.mxu1 %v260_v6  ;;  %v243_v36 = vld [vmem:[%s983_s5 + $0xc8] sm:$0xff]  ;;  %v244_v37 = vld [vmem:[%s983_s5 + $0xd0] sm:$0xff]  ;;  %v229_v38 = vld [vmem:[%s983_s5 + $0x58] sm:$0xff] }
  0x18   : > { %808 = vmatprep.subr.mxu0 %v259_v7  ;;  %897 = vmatpush3.msra.mxu1 %v260_v6  ;;  %v230_v39 = vld [vmem:[%s983_s5 + $0x60] sm:$0xff]  ;;  %v245_v40 = vld [vmem:[%s983_s5 + $0xd8] sm:$0xff]  ;;  %v231_v42 = vld [vmem:[%s983_s5 + $0x68] sm:$0xff] }
  0x19   : > { %809 = vmatpush3.msra.mxu0 %v259_v7  ;;  %882 = vmatprep.subr.mxu1 %v259_v7  ;;  %v246_v41 = vld [vmem:[%s983_s5 + $0xe0] sm:$0xff]  ;;  %v232_v43 = vld [vmem:[%s983_s5 + $0x70] sm:$0xff]  ;;  %v247_v44 = vld [vmem:[%s983_s5 + $0xe8] sm:$0xff] }
  0x1a   : > { %810 = vmatprep.subr.mxu0 %v258_v8  ;;  %898 = vmatpush3.msra.mxu1 %v259_v7  ;;  %v248_v45 = vld [vmem:[%s983_s5 + $0xf0] sm:$0xff]  ;;  %v233_v46 = vld [vmem:[%s983_s5 + $0x78] sm:$0xff] }
  0x1b   : > { %811 = vmatpush3.msra.mxu0 %v258_v8  ;;  %883 = vmatprep.subr.mxu1 %v258_v8  ;;  %v249_v47 = vld [vmem:[%s983_s5 + $0xf8] sm:$0xff]  ;;  %s214_s5 = scalar_lea.vmem %s1175_s3, %s1180_s16 }
  0x1c   : > { %812 = vmatprep.subr.mxu0 %v257_v9  ;;  %899 = vmatpush3.msra.mxu1 %v258_v8 }
  0x1d   : > { %813 = vmatpush3.msra.mxu0 %v257_v9  ;;  %884 = vmatprep.subr.mxu1 %v257_v9 }
  0x1e   : > { %814 = vmatprep.subr.mxu0 %v256_v10  ;;  %900 = vmatpush3.msra.mxu1 %v257_v9 }
  0x1f   : > { %815 = vmatpush3.msra.mxu0 %v256_v10  ;;  %885 = vmatprep.subr.mxu1 %v256_v10 }
  0x20   : > { %816 = vmatprep.subr.mxu0 %v255_v11  ;;  %901 = vmatpush3.msra.mxu1 %v256_v10 }
  0x21   : > { %817 = vmatpush3.msra.mxu0 %v255_v11  ;;  %886 = vmatprep.subr.mxu1 %v255_v11 }
  0x22   : > { %818 = vmatprep.subr.mxu0 %v254_v12  ;;  %902 = vmatpush3.msra.mxu1 %v255_v11 }
  0x23   : > { %819 = vmatpush3.msra.mxu0 %v254_v12  ;;  %887 = vmatprep.subr.mxu1 %v254_v12 }
  0x24   : > { %820 = vmatprep.subr.mxu0 %v253_v13  ;;  %903 = vmatpush3.msra.mxu1 %v254_v12 }
  0x25   : > { %821 = vmatpush3.msra.mxu0 %v253_v13  ;;  %888 = vmatprep.subr.mxu1 %v253_v13 }
  0x26   : > { %822 = vmatprep.subr.mxu0 %v252_v14  ;;  %904 = vmatpush3.msra.mxu1 %v253_v13 }
  0x27   : > { %823 = vmatpush3.msra.mxu0 %v252_v14  ;;  %889 = vmatprep.subr.mxu1 %v252_v14 }
  0x28   : > { %824 = vmatprep.subr.mxu0 %v251_v15  ;;  %905 = vmatpush3.msra.mxu1 %v252_v14 }
  0x29   : > { %825 = vmatpush3.msra.mxu0 %v251_v15  ;;  %890 = vmatprep.subr.mxu1 %v251_v15 }
  0x2a   : > { %826 = vmatprep.subr.mxu0 %v250_v16  ;;  %906 = vmatpush3.msra.mxu1 %v251_v15 }
  0x2b   : > { %827 = vmatpush3.msra.mxu0 %v250_v16  ;;  %891 = vmatprep.subr.mxu1 %v250_v16 }
  0x2c   : > { %829 = vmatmul.mubr.f32.vlgmr.msra.gmra.mxu0 %v219_v17  ;;  %907 = vmatpush3.msra.mxu1 %v250_v16 }
  0x2d   : > { %831 = vmatprep.mubr.f32.mxu0 %v220_v18  ;;  %852 = vmatprep.mubr.f32.mxu1 %v234_v19 }
  0x2e   : > { %853 = vmatmul.mubr.f32.vlgmr.msra.gmra.mxu1 %v235_v20 }
  0x2f   : > { %855 = vmatprep.mubr.f32.mxu1 %v236_v21 }
  0x30   : > { %832 = vmatmul.mubr.f32.gmra.mxu0 %v221_v22 }
  0x31   : > { %834 = vmatprep.mubr.f32.mxu0 %v222_v23 }
  0x32   : > { %856 = vmatmul.mubr.f32.gmra.mxu1 %v237_v24 }
  0x33   : > { %858 = vmatprep.mubr.f32.mxu1 %v238_v25 }
  0x34   : > { %835 = vmatmul.mubr.f32.gmra.mxu0 %v223_v26 }
  0x35   : > { %837 = vmatprep.mubr.f32.mxu0 %v224_v27 }
  0x36   : > { %859 = vmatmul.mubr.f32.gmra.mxu1 %v239_v28 }
  0x37   : > { %861 = vmatprep.mubr.f32.mxu1 %v240_v29 }
  0x38   : > { %838 = vmatmul.mubr.f32.gmra.mxu0 %v225_v30 }
  0x39   : > { %840 = vmatprep.mubr.f32.mxu0 %v226_v31 }
  0x3a   : > { %862 = vmatmul.mubr.f32.gmra.mxu1 %v241_v32 }
  0x3b   : > { %864 = vmatprep.mubr.f32.mxu1 %v242_v33 }
  0x3c   : > { %841 = vmatmul.mubr.f32.gmra.mxu0 %v227_v34 }
  0x3d   : > { %843 = vmatprep.mubr.f32.mxu0 %v228_v35 }
  0x3e   : > { %865 = vmatmul.mubr.f32.gmra.mxu1 %v243_v36 }
  0x3f   : > { %867 = vmatprep.mubr.f32.mxu1 %v244_v37 }
  0x40   : > { %844 = vmatmul.mubr.f32.gmra.mxu0 %v229_v38 }
  0x41   : > { %846 = vmatprep.mubr.f32.mxu0 %v230_v39 }
  0x42   : > { %868 = vmatmul.mubr.f32.gmra.mxu1 %v245_v40 }
  0x43   : > { %870 = vmatprep.mubr.f32.mxu1 %v246_v41 }
  0x44   : > { %847 = vmatmul.mubr.f32.gmra.mxu0 %v231_v42 }
  0x45   : > { %849 = vmatprep.mubr.f32.mxu0 %v232_v43 }
  0x46   : > { %871 = vmatmul.mubr.f32.gmra.mxu1 %v247_v44 }
  0x47   : > { %873 = vmatprep.mubr.f32.mxu1 %v248_v45 }
  0x48   : > { %850 = vmatmul.mubr.f32.gmra.mxu0 %v233_v46 }
  0x4a   : > { %874 = vmatmul.mubr.f32.gmra.mxu1 %v249_v47 }
  0xec   : > { %v830_v48 = vpop.f32.mrf.mxu0 }
  0xed   : > { %492 = vst [vmem:[%s1055_s9 + $0x8] sm:$0xff] %v830_v48  ;;  %v562_v54 = vmul.f32 %v830_v48, %v830_v48 }
  0xee   : > { %v332_v49 = vpop.f32.mrf.mxu0  ;;  %v1058_v50 = vpop.f32.mrf.mxu1 }
  0xef   : > { %491 = vst [vmem:[%s1055_s9] sm:$0xff] %v332_v49  ;;  %v561_v51 = vmul.f32 %v332_v49, %v332_v49  ;;  %508 = vst [vmem:[%s1055_s9 + $0x88] sm:$0xff] %v1058_v50  ;;  %v523_v55 = vadd.f32 %v830_v48, %v332_v49 }
  0xf0   : > { %v833_v52 = vpop.f32.mrf.mxu0  ;;  %v1063_v53 = vpop.f32.mrf.mxu1 }
  0xf1   : > { %494 = vst [vmem:[%s1055_s9 + $0x18] sm:$0xff] %v833_v52  ;;  %507 = vst [vmem:[%s1055_s9 + $0x80] sm:$0xff] %v1063_v53  ;;  %v593_v58 = vadd.f32 %v562_v54, %v561_v51  ;;  %v564_v63 = vmul.f32 %v833_v52, %v833_v52 }
  0xf2   : > { %v342_v56 = vpop.f32.mrf.mxu0  ;;  %v1068_v57 = vpop.f32.mrf.mxu1 }
  0xf3   : > { %493 = vst [vmem:[%s1055_s9 + $0x10] sm:$0xff] %v342_v56  ;;  %v524_v59 = vadd.f32 %v523_v55, %v342_v56  ;;  %v563_v60 = vmul.f32 %v342_v56, %v342_v56  ;;  %510 = vst [vmem:[%s1055_s9 + $0x98] sm:$0xff] %v1068_v57 }
  0xf4   : > { %v836_v61 = vpop.f32.mrf.mxu0  ;;  %v1073_v62 = vpop.f32.mrf.mxu1 }
  0xf5   : > { %v594_v0 = vadd.f32 %v593_v58, %v563_v60  ;;  %496 = vst [vmem:[%s1055_s9 + $0x28] sm:$0xff] %v836_v61  ;;  %v525_v1 = vadd.f32 %v833_v52, %v524_v59  ;;  %509 = vst [vmem:[%s1055_s9 + $0x90] sm:$0xff] %v1073_v62  ;;  %v566_v9 = vmul.f32 %v836_v61, %v836_v61 }
  0xf6   : > { %v352_v2 = vpop.f32.mrf.mxu0  ;;  %v1078_v3 = vpop.f32.mrf.mxu1 }
  0xf7   : > { %495 = vst [vmem:[%s1055_s9 + $0x20] sm:$0xff] %v352_v2  ;;  %v526_v4 = vadd.f32 %v525_v1, %v352_v2  ;;  %v565_v5 = vmul.f32 %v352_v2, %v352_v2  ;;  %v595_v6 = vadd.f32 %v594_v0, %v564_v63  ;;  %512 = vst [vmem:[%s1055_s9 + $0xa8] sm:$0xff] %v1078_v3 }
  0xf8   : > { %v839_v7 = vpop.f32.mrf.mxu0  ;;  %v1083_v8 = vpop.f32.mrf.mxu1 }
  0xf9   : > { %v596_v10 = vadd.f32 %v595_v6, %v565_v5  ;;  %498 = vst [vmem:[%s1055_s9 + $0x38] sm:$0xff] %v839_v7  ;;  %v527_v11 = vadd.f32 %v836_v61, %v526_v4  ;;  %511 = vst [vmem:[%s1055_s9 + $0xa0] sm:$0xff] %v1083_v8  ;;  %v568_v19 = vmul.f32 %v839_v7, %v839_v7 }
  0xfa   : > { %v362_v12 = vpop.f32.mrf.mxu0  ;;  %v1088_v13 = vpop.f32.mrf.mxu1  ;;  %v577_v4 = vmul.f32 %v1063_v53, %v1063_v53  ;;  %v578_v5 = vmul.f32 %v1058_v50, %v1058_v50 }
  0xfb   : > { %497 = vst [vmem:[%s1055_s9 + $0x30] sm:$0xff] %v362_v12  ;;  %v528_v14 = vadd.f32 %v527_v11, %v362_v12  ;;  %v567_v15 = vmul.f32 %v362_v12, %v362_v12  ;;  %v597_v16 = vadd.f32 %v596_v10, %v566_v9  ;;  %514 = vst [vmem:[%s1055_s9 + $0xb8] sm:$0xff] %v1088_v13 }
  0xfc   : > { %v842_v17 = vpop.f32.mrf.mxu0  ;;  %v1093_v18 = vpop.f32.mrf.mxu1  ;;  %v579_v10 = vmul.f32 %v1073_v62, %v1073_v62  ;;  %v580_v12 = vmul.f32 %v1068_v57, %v1068_v57 }
  0xfd   : > { %v598_v20 = vadd.f32 %v597_v16, %v567_v15  ;;  %500 = vst [vmem:[%s1055_s9 + $0x48] sm:$0xff] %v842_v17  ;;  %v529_v21 = vadd.f32 %v839_v7, %v528_v14  ;;  %513 = vst [vmem:[%s1055_s9 + $0xb0] sm:$0xff] %v1093_v18  ;;  %v570_v29 = vmul.f32 %v842_v17, %v842_v17 }
  0xfe   : > { %v372_v22 = vpop.f32.mrf.mxu0  ;;  %v1098_v23 = vpop.f32.mrf.mxu1  ;;  %v581_v16 = vmul.f32 %v1083_v8, %v1083_v8 }
  0xff   : > { %499 = vst [vmem:[%s1055_s9 + $0x40] sm:$0xff] %v372_v22  ;;  %v530_v24 = vadd.f32 %v529_v21, %v372_v22  ;;  %v569_v25 = vmul.f32 %v372_v22, %v372_v22  ;;  %v599_v26 = vadd.f32 %v598_v20, %v568_v19  ;;  %516 = vst [vmem:[%s1055_s9 + $0xc8] sm:$0xff] %v1098_v23 }
 0x100   : > { %v845_v27 = vpop.f32.mrf.mxu0  ;;  %v1103_v28 = vpop.f32.mrf.mxu1  ;;  %v583_v21 = vmul.f32 %v1093_v18, %v1093_v18 }
 0x101   : > { %v600_v30 = vadd.f32 %v599_v26, %v569_v25  ;;  %502 = vst [vmem:[%s1055_s9 + $0x58] sm:$0xff] %v845_v27  ;;  %v531_v31 = vadd.f32 %v842_v17, %v530_v24  ;;  %515 = vst [vmem:[%s1055_s9 + $0xc0] sm:$0xff] %v1103_v28  ;;  %v572_v39 = vmul.f32 %v845_v27, %v845_v27 }
 0x102   : > { %v382_v32 = vpop.f32.mrf.mxu0  ;;  %v1108_v33 = vpop.f32.mrf.mxu1  ;;  %v585_v26 = vmul.f32 %v1103_v28, %v1103_v28 }
 0x103   : > { %501 = vst [vmem:[%s1055_s9 + $0x50] sm:$0xff] %v382_v32  ;;  %v532_v34 = vadd.f32 %v531_v31, %v382_v32  ;;  %v571_v35 = vmul.f32 %v382_v32, %v382_v32  ;;  %v601_v36 = vadd.f32 %v600_v30, %v570_v29  ;;  %518 = vst [vmem:[%s1055_s9 + $0xd8] sm:$0xff] %v1108_v33 }
 0x104   : > { %v848_v37 = vpop.f32.mrf.mxu0  ;;  %v462_v38 = vpop.f32.mrf.mxu1 }
 0x105   : > { %v602_v40 = vadd.f32 %v601_v36, %v571_v35  ;;  %504 = vst [vmem:[%s1055_s9 + $0x68] sm:$0xff] %v848_v37  ;;  %v533_v41 = vadd.f32 %v845_v27, %v532_v34  ;;  %517 = vst [vmem:[%s1055_s9 + $0xd0] sm:$0xff] %v462_v38  ;;  %v574_v49 = vmul.f32 %v848_v37, %v848_v37 }
 0x106   : > { %v392_v42 = vpop.f32.mrf.mxu0  ;;  %v1115_v43 = vpop.f32.mrf.mxu1  ;;  %v587_v31 = vmul.f32 %v462_v38, %v462_v38  ;;  %v588_v34 = vmul.f32 %v1108_v33, %v1108_v33 }
 0x107   : > { %503 = vst [vmem:[%s1055_s9 + $0x60] sm:$0xff] %v392_v42  ;;  %v534_v44 = vadd.f32 %v533_v41, %v392_v42  ;;  %v573_v45 = vmul.f32 %v392_v42, %v392_v42  ;;  %v603_v46 = vadd.f32 %v602_v40, %v572_v39  ;;  %520 = vst [vmem:[%s1055_s9 + $0xe8] sm:$0xff] %v1115_v43 }
 0x108   : > { %v851_v47 = vpop.f32.mrf.mxu0  ;;  %v472_v48 = vpop.f32.mrf.mxu1  ;;  %v590_v39 = vmul.f32 %v1115_v43, %v1115_v43 }
 0x109   : > { %v604_v51 = vadd.f32 %v603_v46, %v573_v45  ;;  %506 = vst [vmem:[%s1055_s9 + $0x78] sm:$0xff] %v851_v47  ;;  %v535_v52 = vadd.f32 %v848_v37, %v534_v44  ;;  %519 = vst [vmem:[%s1055_s9 + $0xe0] sm:$0xff] %v472_v48  ;;  %v576_v61 = vmul.f32 %v851_v47, %v851_v47 }
 0x10a   : > { %v402_v54 = vpop.f32.mrf.mxu0  ;;  %v875_v55 = vpop.f32.mrf.mxu1  ;;  %v589_v37 = vmul.f32 %v472_v48, %v472_v48 }
 0x10b   : > { %505 = vst [vmem:[%s1055_s9 + $0x70] sm:$0xff] %v402_v54  ;;  %v536_v56 = vadd.f32 %v535_v52, %v402_v54  ;;  %v575_v58 = vmul.f32 %v402_v54, %v402_v54  ;;  %v605_v59 = vadd.f32 %v604_v51, %v574_v49  ;;  %522 = vst [vmem:[%s1055_s9 + $0xf8] sm:$0xff] %v875_v55 }
 0x10c   : > { %v482_v60 = vpop.f32.mrf.mxu1  ;;  %v592_v44 = vmul.f32 %v875_v55, %v875_v55 }
 0x10d   : > { %v537_v63 = vadd.f32 %v851_v47, %v536_v56  ;;  %v606_v0 = vadd.f32 %v605_v59, %v575_v58  ;;  %521 = vst [vmem:[%s1055_s9 + $0xf0] sm:$0xff] %v482_v60 }
 0x10f   : > { %v607_v1 = vadd.f32 %v606_v0, %v576_v61  ;;  %v538_v2 = vadd.f32 %v537_v63, %v1063_v53 }
 0x111   : > { %v608_v6 = vadd.f32 %v607_v1, %v577_v4  ;;  %v539_v7 = vadd.f32 %v1058_v50, %v538_v2  ;;  %v582_v50 = vmul.f32 %v1078_v3, %v1078_v3 }
 0x113   : > { %v540_v9 = vadd.f32 %v539_v7, %v1073_v62  ;;  %v609_v11 = vadd.f32 %v608_v6, %v578_v5 }
 0x115   : > { %v610_v14 = vadd.f32 %v609_v11, %v579_v10  ;;  %v541_v15 = vadd.f32 %v1068_v57, %v540_v9  ;;  %v584_v57 = vmul.f32 %v1088_v13, %v1088_v13 }
 0x117   : > { %v542_v53 = vadd.f32 %v541_v15, %v1083_v8  ;;  %v611_v17 = vadd.f32 %v610_v14, %v580_v12 }
 0x119   : > { %v612_v19 = vadd.f32 %v611_v17, %v581_v16  ;;  %v543_v20 = vadd.f32 %v1078_v3, %v542_v53  ;;  %v586_v3 = vmul.f32 %v1098_v23, %v1098_v23 }
 0x11b   : > { %v544_v62 = vadd.f32 %v543_v20, %v1093_v18  ;;  %v613_v22 = vadd.f32 %v612_v19, %v582_v50 }
 0x11d   : > { %v614_v24 = vadd.f32 %v613_v22, %v583_v21  ;;  %v545_v25 = vadd.f32 %v1088_v13, %v544_v62 }
 0x11f   : > { %v546_v8 = vadd.f32 %v545_v25, %v1103_v28  ;;  %v615_v27 = vadd.f32 %v614_v24, %v584_v57 }
 0x121   : > { %v616_v29 = vadd.f32 %v615_v27, %v585_v26  ;;  %v547_v30 = vadd.f32 %v1098_v23, %v546_v8 }
 0x123   : > { %v548_v18 = vadd.f32 %v547_v30, %v462_v38  ;;  %v617_v32 = vadd.f32 %v616_v29, %v586_v3  ;;  %v591_v38 = vmul.f32 %v482_v60, %v482_v60 }
 0x125   : > { %v618_v35 = vadd.f32 %v617_v32, %v587_v31  ;;  %v549_v13 = vadd.f32 %v1108_v33, %v548_v18 }
 0x127   : > { %v550_v36 = vadd.f32 %v549_v13, %v472_v48  ;;  %v619_v28 = vadd.f32 %v618_v35, %v588_v34 }
 0x129   : > { %v620_v40 = vadd.f32 %v619_v28, %v589_v37  ;;  %v551_v23 = vadd.f32 %v1115_v43, %v550_v36 }
 0x12b   : > { %v552_v41 = vadd.f32 %v551_v23, %v482_v60  ;;  %v621_v42 = vadd.f32 %v620_v40, %v590_v39 }
 0x12d   : > { %v553_v45 = vadd.f32 %v875_v55, %v552_v41  ;;  %v622_v46 = vadd.f32 %v621_v42, %v591_v38 }
 0x12f   : > { %v554_v47 = vrot.slane %v553_v45, 4  ;;  %v623_v49 = vadd.f32 %v622_v46, %v592_v44 }
 0x131   : > { %v555_v33 = vadd.f32 %v554_v47, %v553_v45  ;;  %v624_v51 = vrot.slane %v623_v49, 4 }
 0x133   : > { %v556_v48 = vrot.slane %v555_v33, 2  ;;  %v625_v52 = vadd.f32 %v624_v51, %v623_v49 }
 0x135   : > { %v557_v54 = vadd.f32 %v556_v48, %v555_v33  ;;  %v626_v56 = vrot.slane %v625_v52, 2 }
 0x137   : > { %v558_v58 = vrot.slane %v557_v54, 1  ;;  %v627_v59 = vadd.f32 %v626_v56, %v625_v52 }
 0x139   : > { %v559_v43 = vadd.f32 %v558_v58, %v557_v54  ;;  %v628_v60 = vrot.slane %v627_v59, 1 }
 0x13b   : > { %560 = vst [vmem:[%s214_s5] sm:$0x1] %v559_v43  ;;  %v629_v55 = vadd.f32 %v628_v60, %v627_v59 }
 0x13d   : > { %630 = vst [vmem:[%s217_s12] sm:$0x1] %v629_v55 }
 0x13e PF: > { %s15_s15 = sadd.s32 1, %s922_s15  }
 0x13f   : > { %p12_p5 = scmp.ge.s32.totalorder %s15_s15, 4  }
 0x141   :  { %14 = sbr.rel (!%p12_p5) target bundleno = 1 (0x1), region = 82 }

</bundles_post_ra>
